<compile_context>
chip_gen: v6e
topology: v6e:2x2x1
jax: 0.10.0
libtpu: 0.0.40
codegen_flags: <defaults>
</compile_context>

<pallas_src>
import jax
import jax.numpy as jnp
from jax import lax
from jax.experimental import pallas as pl
from jax.experimental.pallas import tpu as pltpu


def ffn_kernel(x_ref, w1_ref, b1_ref, w2_ref, b2_ref, gamma_ref, beta_ref, o_ref):
    # f32 copy of x for the residual / LayerNorm epilogue.
    x_f32 = x_ref[...].astype(jnp.float32)                       # (tm, D)
    x_mm = x_ref[...].astype(w1_ref.dtype)                       # matmul dtype

    # Linear 1 + ReLU (MXU, f32 accumulate).
    h = jnp.dot(x_mm, w1_ref[...], preferred_element_type=jnp.float32)
    h = jnp.maximum(h + b1_ref[...], 0.0)                        # (tm, dff) f32

    # Linear 2 (MXU, f32 accumulate).
    y = jnp.dot(h.astype(w2_ref.dtype), w2_ref[...],
                preferred_element_type=jnp.float32) + b2_ref[...]

    # Dropout(p=0.0) is the identity.

    # Residual + LayerNorm over last dim (eps=1e-5, affine) in f32.
    z = x_f32 + y
    mean = jnp.mean(z, axis=-1, keepdims=True)
    ctr = z - mean
    var = jnp.mean(ctr * ctr, axis=-1, keepdims=True)
    zn = ctr * lax.rsqrt(var + 1e-5)
    o_ref[...] = (zn * gamma_ref[...] + beta_ref[...]).astype(o_ref.dtype)


def _round_up(a, b):
    return (a + b - 1) // b * b


def _build_ffn_call(M_pad, D, dff, tm, io_dtype, mm_dtype, single_buffer_params):
    grid = (M_pad // tm,)

    def _const_spec(shape):
        idx = lambda i: (0,) * len(shape)
        if single_buffer_params:
            # Constant index_map -> never re-DMA'd; one VMEM buffer suffices.
            return pl.BlockSpec(shape, idx, pipeline_mode=pl.Buffered(1))
        return pl.BlockSpec(shape, idx)

    in_specs = [
        pl.BlockSpec((tm, D), lambda i: (i, 0)),   # x row tile
        _const_spec((D, dff)),                     # W1^T (resident)
        _const_spec((1, dff)),                     # b1
        _const_spec((dff, D)),                     # W2^T (resident)
        _const_spec((1, D)),                       # b2
        _const_spec((1, D)),                       # gamma
        _const_spec((1, D)),                       # beta
    ]
    out_specs = pl.BlockSpec((tm, D), lambda i: (i, 0))

    # Rough VMEM budget: I/O tiles (double-buffered), resident weights,
    # f32 intermediates; clamp to [32 MiB, 64 MiB] (v7x-safe ceiling).
    bpe_io = jnp.dtype(io_dtype).itemsize
    bpe_mm = jnp.dtype(mm_dtype).itemsize
    wbuf = 1 if single_buffer_params else 2
    est = (
        2 * tm * D * bpe_io                 # x tile, double-buffered
        + 2 * tm * D * bpe_io               # out tile, double-buffered
        + wbuf * 2 * D * dff * bpe_mm       # W1^T + W2^T
        + wbuf * (dff + 3 * D) * 4          # b1, b2, gamma, beta
        + tm * dff * 4                      # h (f32)
        + 4 * tm * D * 4                    # f32 epilogue temporaries
    )
    vmem_limit = int(min(max(est * 3 // 2, 32 * 1024 * 1024), 64 * 1024 * 1024))

    cost = pl.CostEstimate(
        flops=4 * M_pad * D * dff + 10 * M_pad * D,
        transcendentals=M_pad,                          # rsqrt per row
        bytes_accessed=int(2 * M_pad * D * bpe_io       # x in + o out
                           + 2 * D * dff * bpe_mm       # W1^T + W2^T
                           + (dff + 3 * D) * 4),        # biases + LN params
    )

    return pl.pallas_call(
        ffn_kernel,
        out_shape=jax.ShapeDtypeStruct((M_pad, D), io_dtype),
        grid_spec=pltpu.PrefetchScalarGridSpec(
            num_scalar_prefetch=0,
            grid=grid,
            in_specs=in_specs,
            out_specs=out_specs,
        ),
        compiler_params=pltpu.CompilerParams(
            dimension_semantics=("parallel",),
            vmem_limit_bytes=vmem_limit,
        ),
        cost_estimate=cost,
    )


def position_wise_ffn(x, w1, b1, w2, b2, gamma, beta, *, tm=256,
                      matmul_dtype=jnp.bfloat16):
    """PositionWiseFFN forward.

    x: [batch, seq, D] (float32). PyTorch-layout params:
    w1 (dff, D), b1 (dff,), w2 (D, dff), b2 (D,), gamma/beta (D,).
    Returns [batch, seq, D].
    """
    B, S, D = x.shape
    dff = w1.shape[0]
    M = B * S

    # Effective row tile: MXU-sized by default, shrunk only when M is small;
    # always a multiple of 8 so the sublane tiling constraint holds.
    tm_eff = _round_up(min(tm, _round_up(M, 8)), 8)
    M_pad = _round_up(M, tm_eff)

    x2 = x.reshape(M, D)
    if M_pad != M:
        x2 = jnp.pad(x2, ((0, M_pad - M), (0, 0)))   # padded rows sliced off below

    w1t = jnp.transpose(w1).astype(matmul_dtype)     # (D, dff)
    w2t = jnp.transpose(w2).astype(matmul_dtype)     # (dff, D)
    b1_2d = b1.reshape(1, dff).astype(jnp.float32)
    b2_2d = b2.reshape(1, D).astype(jnp.float32)
    g_2d = gamma.reshape(1, D).astype(jnp.float32)
    be_2d = beta.reshape(1, D).astype(jnp.float32)

    args = (x2, w1t, b1_2d, w2t, b2_2d, g_2d, be_2d)
    try:
        call = _build_ffn_call(M_pad, D, dff, tm_eff, x.dtype, matmul_dtype,
                               single_buffer_params=True)
        out = call(*args)
    except Exception:
        # Fallback if pl.Buffered(1) on inputs is unsupported in this Pallas build.
        call = _build_ffn_call(M_pad, D, dff, tm_eff, x.dtype, matmul_dtype,
                               single_buffer_params=False)
        out = call(*args)

    if M_pad != M:
        out = out[:M]
    return out.reshape(B, S, D)


def _ref_ffn(x, w1, b1, w2, b2, gamma, beta):
    h = jnp.maximum(x @ w1.T + b1, 0.0)
    y = h @ w2.T + b2
    z = x + y
    mean = jnp.mean(z, axis=-1, keepdims=True)
    var = jnp.mean((z - mean) ** 2, axis=-1, keepdims=True)
    return (z - mean) / jnp.sqrt(var + 1e-5) * gamma + beta


if __name__ == "__main__":
    key = jax.random.PRNGKey(0)
    batch, seq, model_dim = 2, 8, 32
    dff = model_dim * 4

    ks = jax.random.split(key, 7)
    x = jax.random.normal(ks[0], (batch, seq, model_dim), dtype=jnp.float32)
    # PyTorch Linear layout: weight (out, in).
    w1 = jax.random.normal(ks[1], (dff, model_dim), dtype=jnp.float32) * 0.1
    b1 = jax.random.normal(ks[2], (dff,), dtype=jnp.float32) * 0.1
    w2 = jax.random.normal(ks[3], (model_dim, dff), dtype=jnp.float32) * 0.1
    b2 = jax.random.normal(ks[4], (model_dim,), dtype=jnp.float32) * 0.1
    gamma = 1.0 + 0.1 * jax.random.normal(ks[5], (model_dim,), dtype=jnp.float32)
    beta = 0.1 * jax.random.normal(ks[6], (model_dim,), dtype=jnp.float32)

    ref = _ref_ffn(x, w1, b1, w2, b2, gamma, beta)

    # 1) f32 matmul path: tight check against the reference.
    out_f32 = jax.block_until_ready(
        position_wise_ffn(x, w1, b1, w2, b2, gamma, beta,
                          matmul_dtype=jnp.float32))
    assert out_f32.shape == (batch, seq, model_dim)
    assert jnp.allclose(out_f32, ref, atol=1e-4, rtol=1e-4)

    # 2) Default bf16-matmul path (f32 accumulation + f32 LayerNorm): looser tol.
    out_bf16 = jax.block_until_ready(
        position_wise_ffn(x, w1, b1, w2, b2, gamma, beta))
    assert out_bf16.shape == (batch, seq, model_dim)
    assert jnp.allclose(out_bf16, ref, atol=5e-2, rtol=5e-2)

    # 3) Ragged M (batch*seq not a multiple of the tile): padded tail + grid > 1.
    xr = jax.random.normal(ks[0], (3, 5, model_dim), dtype=jnp.float32)
    out_r = jax.block_until_ready(
        position_wise_ffn(xr, w1, b1, w2, b2, gamma, beta, tm=8))
    ref_r = _ref_ffn(xr, w1, b1, w2, b2, gamma, beta)
    assert out_r.shape == (3, 5, model_dim)
    assert jnp.allclose(out_r, ref_r, atol=5e-2, rtol=5e-2)

    print("KERNEL_OK")
</pallas_src>

<mosaic_0001>
module attributes {stable_mosaic.version = 11 : i64} {
  func.func @ffn_kernel(%arg0: i32, %arg1: memref<16x32xf32, #tpu.memory_space<vmem>>, %arg2: memref<32x128xf32, #tpu.memory_space<vmem>>, %arg3: memref<1x128xf32, #tpu.memory_space<vmem>>, %arg4: memref<128x32xf32, #tpu.memory_space<vmem>>, %arg5: memref<1x32xf32, #tpu.memory_space<vmem>>, %arg6: memref<1x32xf32, #tpu.memory_space<vmem>>, %arg7: memref<1x32xf32, #tpu.memory_space<vmem>>, %arg8: memref<16x32xf32, #tpu.memory_space<vmem>>) attributes {dimension_semantics = [#tpu.dimension_semantics<parallel>], iteration_bounds = array<i64: 1>, scalar_prefetch = 0 : i64, scratch_operands = 0 : i64, tpu.core_type = #tpu.core_type<tc>, window_params = [{transform_indices = @transform_0, window_bounds = array<i64: 16, 32>}, {pipeline_mode = #tpu.pipeline_mode<synchronous>, transform_indices = @transform_1, window_bounds = array<i64: 32, 128>}, {pipeline_mode = #tpu.pipeline_mode<synchronous>, transform_indices = @transform_2, window_bounds = array<i64: 1, 128>}, {pipeline_mode = #tpu.pipeline_mode<synchronous>, transform_indices = @transform_3, window_bounds = array<i64: 128, 32>}, {pipeline_mode = #tpu.pipeline_mode<synchronous>, transform_indices = @transform_4, window_bounds = array<i64: 1, 32>}, {pipeline_mode = #tpu.pipeline_mode<synchronous>, transform_indices = @transform_5, window_bounds = array<i64: 1, 32>}, {pipeline_mode = #tpu.pipeline_mode<synchronous>, transform_indices = @transform_6, window_bounds = array<i64: 1, 32>}, {transform_indices = @transform_7, window_bounds = array<i64: 16, 32>}]} {
    %c0 = arith.constant 0 : index
    %c0_0 = arith.constant 0 : index
    %0 = vector.load %arg1[%c0, %c0_0] : memref<16x32xf32, #tpu.memory_space<vmem>>, vector<16x32xf32>
    %c0_1 = arith.constant 0 : index
    %c0_2 = arith.constant 0 : index
    %1 = vector.load %arg1[%c0_1, %c0_2] : memref<16x32xf32, #tpu.memory_space<vmem>>, vector<16x32xf32>
    %c0_3 = arith.constant 0 : index
    %c0_4 = arith.constant 0 : index
    %2 = vector.load %arg2[%c0_3, %c0_4] : memref<32x128xf32, #tpu.memory_space<vmem>>, vector<32x128xf32>
    %cst = arith.constant dense<0.000000e+00> : vector<16x128xf32>
    %3 = tpu.matmul %1, %2, %cst {dimension_numbers = #tpu.dot_dimension_numbers<[1], [0], [0], [1], [0, 0, 1, 1], [], []>} : vector<16x32xf32>, vector<32x128xf32>, vector<16x128xf32> -> vector<16x128xf32>
    %c0_5 = arith.constant 0 : index
    %c0_6 = arith.constant 0 : index
    %4 = vector.load %arg3[%c0_5, %c0_6] : memref<1x128xf32, #tpu.memory_space<vmem>>, vector<1x128xf32>
    %5 = vector.broadcast %4 : vector<1x128xf32> to vector<16x128xf32>
    %6 = arith.addf %3, %5 : vector<16x128xf32>
    %cst_7 = arith.constant 0.000000e+00 : f32
    %7 = vector.broadcast %cst_7 : f32 to vector<16x128xf32>
    %8 = arith.maximumf %6, %7 : vector<16x128xf32>
    %c0_8 = arith.constant 0 : index
    %c0_9 = arith.constant 0 : index
    %9 = vector.load %arg4[%c0_8, %c0_9] : memref<128x32xf32, #tpu.memory_space<vmem>>, vector<128x32xf32>
    %cst_10 = arith.constant dense<0.000000e+00> : vector<16x32xf32>
    %10 = tpu.matmul %8, %9, %cst_10 {dimension_numbers = #tpu.dot_dimension_numbers<[1], [0], [0], [1], [0, 0, 1, 1], [], []>} : vector<16x128xf32>, vector<128x32xf32>, vector<16x32xf32> -> vector<16x32xf32>
    %c0_11 = arith.constant 0 : index
    %c0_12 = arith.constant 0 : index
    %11 = vector.load %arg5[%c0_11, %c0_12] : memref<1x32xf32, #tpu.memory_space<vmem>>, vector<1x32xf32>
    %12 = vector.broadcast %11 : vector<1x32xf32> to vector<16x32xf32>
    %13 = arith.addf %10, %12 : vector<16x32xf32>
    %14 = arith.addf %0, %13 : vector<16x32xf32>
    %cst_13 = arith.constant dense<0.000000e+00> : vector<16xf32>
    %15 = vector.multi_reduction <add>, %14, %cst_13 [1] : vector<16x32xf32> to vector<16xf32>
    %16 = vector.shape_cast %15 : vector<16xf32> to vector<16x1xf32>
    %cst_14 = arith.constant 3.200000e+01 : f32
    %17 = vector.broadcast %cst_14 : f32 to vector<16x1xf32>
    %18 = arith.divf %16, %17 : vector<16x1xf32>
    %19 = vector.broadcast %18 : vector<16x1xf32> to vector<16x32xf32>
    %20 = arith.subf %14, %19 : vector<16x32xf32>
    %21 = arith.mulf %20, %20 : vector<16x32xf32>
    %cst_15 = arith.constant dense<0.000000e+00> : vector<16xf32>
    %22 = vector.multi_reduction <add>, %21, %cst_15 [1] : vector<16x32xf32> to vector<16xf32>
    %23 = vector.shape_cast %22 : vector<16xf32> to vector<16x1xf32>
    %cst_16 = arith.constant 3.200000e+01 : f32
    %24 = vector.broadcast %cst_16 : f32 to vector<16x1xf32>
    %25 = arith.divf %23, %24 : vector<16x1xf32>
    %cst_17 = arith.constant 9.99999974E-6 : f32
    %26 = vector.broadcast %cst_17 : f32 to vector<16x1xf32>
    %27 = arith.addf %25, %26 : vector<16x1xf32>
    %28 = math.rsqrt %27 : vector<16x1xf32>
    %29 = vector.broadcast %28 : vector<16x1xf32> to vector<16x32xf32>
    %30 = arith.mulf %20, %29 : vector<16x32xf32>
    %c0_18 = arith.constant 0 : index
    %c0_19 = arith.constant 0 : index
    %31 = vector.load %arg6[%c0_18, %c0_19] : memref<1x32xf32, #tpu.memory_space<vmem>>, vector<1x32xf32>
    %32 = vector.broadcast %31 : vector<1x32xf32> to vector<16x32xf32>
    %33 = arith.mulf %30, %32 : vector<16x32xf32>
    %c0_20 = arith.constant 0 : index
    %c0_21 = arith.constant 0 : index
    %34 = vector.load %arg7[%c0_20, %c0_21] : memref<1x32xf32, #tpu.memory_space<vmem>>, vector<1x32xf32>
    %35 = vector.broadcast %34 : vector<1x32xf32> to vector<16x32xf32>
    %36 = arith.addf %33, %35 : vector<16x32xf32>
    %c0_22 = arith.constant 0 : index
    %c0_23 = arith.constant 0 : index
    %37 = vector.load %arg8[%c0_22, %c0_23] : memref<16x32xf32, #tpu.memory_space<vmem>>, vector<16x32xf32>
    tpu.vector_store %arg8[%c0_22, %c0_23], %36 {strides = array<i32>} : memref<16x32xf32, #tpu.memory_space<vmem>>, vector<16x32xf32>,
    return
  }
  func.func @transform_0(%arg0: i32) -> (i32, i32) {
    %c0_i32 = arith.constant 0 : i32
    %c0_i32_0 = arith.constant 0 : i32
    return %arg0, %c0_i32 : i32, i32
  }
  func.func @transform_1(%arg0: i32) -> (i32, i32) {
    %c0_i32 = arith.constant 0 : i32
    %c0_i32_0 = arith.constant 0 : i32
    %c0_i32_1 = arith.constant 0 : i32
    return %c0_i32, %c0_i32_0 : i32, i32
  }
  func.func @transform_2(%arg0: i32) -> (i32, i32) {
    %c0_i32 = arith.constant 0 : i32
    %c0_i32_0 = arith.constant 0 : i32
    %c0_i32_1 = arith.constant 0 : i32
    return %c0_i32, %c0_i32_0 : i32, i32
  }
  func.func @transform_3(%arg0: i32) -> (i32, i32) {
    %c0_i32 = arith.constant 0 : i32
    %c0_i32_0 = arith.constant 0 : i32
    %c0_i32_1 = arith.constant 0 : i32
    return %c0_i32, %c0_i32_0 : i32, i32
  }
  func.func @transform_4(%arg0: i32) -> (i32, i32) {
    %c0_i32 = arith.constant 0 : i32
    %c0_i32_0 = arith.constant 0 : i32
    %c0_i32_1 = arith.constant 0 : i32
    return %c0_i32, %c0_i32_0 : i32, i32
  }
  func.func @transform_5(%arg0: i32) -> (i32, i32) {
    %c0_i32 = arith.constant 0 : i32
    %c0_i32_0 = arith.constant 0 : i32
    %c0_i32_1 = arith.constant 0 : i32
    return %c0_i32, %c0_i32_0 : i32, i32
  }
  func.func @transform_6(%arg0: i32) -> (i32, i32) {
    %c0_i32 = arith.constant 0 : i32
    %c0_i32_0 = arith.constant 0 : i32
    %c0_i32_1 = arith.constant 0 : i32
    return %c0_i32, %c0_i32_0 : i32, i32
  }
  func.func @transform_7(%arg0: i32) -> (i32, i32) {
    %c0_i32 = arith.constant 0 : i32
    %c0_i32_0 = arith.constant 0 : i32
    return %arg0, %c0_i32 : i32, i32
  }
}

module attributes {stable_mosaic.version = 11 : i64} {
  func.func @ffn_kernel(%arg0: i32, %arg1: memref<16x32xf32, #tpu.memory_space<vmem>>, %arg2: memref<32x128xf32, #tpu.memory_space<vmem>>, %arg3: memref<1x128xf32, #tpu.memory_space<vmem>>, %arg4: memref<128x32xf32, #tpu.memory_space<vmem>>, %arg5: memref<1x32xf32, #tpu.memory_space<vmem>>, %arg6: memref<1x32xf32, #tpu.memory_space<vmem>>, %arg7: memref<1x32xf32, #tpu.memory_space<vmem>>, %arg8: memref<16x32xf32, #tpu.memory_space<vmem>>) attributes {dimension_semantics = [#tpu.dimension_semantics<parallel>], iteration_bounds = array<i64: 1>, scalar_prefetch = 0 : i64, scratch_operands = 0 : i64, tpu.core_type = #tpu.core_type<tc>, window_params = [{transform_indices = @transform_0, window_bounds = array<i64: 16, 32>}, {pipeline_mode = #tpu.pipeline_mode<synchronous>, transform_indices = @transform_1, window_bounds = array<i64: 32, 128>}, {pipeline_mode = #tpu.pipeline_mode<synchronous>, transform_indices = @transform_2, window_bounds = array<i64: 1, 128>}, {pipeline_mode = #tpu.pipeline_mode<synchronous>, transform_indices = @transform_3, window_bounds = array<i64: 128, 32>}, {pipeline_mode = #tpu.pipeline_mode<synchronous>, transform_indices = @transform_4, window_bounds = array<i64: 1, 32>}, {pipeline_mode = #tpu.pipeline_mode<synchronous>, transform_indices = @transform_5, window_bounds = array<i64: 1, 32>}, {pipeline_mode = #tpu.pipeline_mode<synchronous>, transform_indices = @transform_6, window_bounds = array<i64: 1, 32>}, {transform_indices = @transform_7, window_bounds = array<i64: 16, 32>}]} {
    %c0 = arith.constant 0 : index
    %c0_0 = arith.constant 0 : index
    %0 = vector.load %arg1[%c0, %c0_0] : memref<16x32xf32, #tpu.memory_space<vmem>>, vector<16x32xf32>
    %c0_1 = arith.constant 0 : index
    %c0_2 = arith.constant 0 : index
    %1 = vector.load %arg1[%c0_1, %c0_2] : memref<16x32xf32, #tpu.memory_space<vmem>>, vector<16x32xf32>
    %c0_3 = arith.constant 0 : index
    %c0_4 = arith.constant 0 : index
    %2 = vector.load %arg2[%c0_3, %c0_4] : memref<32x128xf32, #tpu.memory_space<vmem>>, vector<32x128xf32>
    %cst = arith.constant dense<0.000000e+00> : vector<16x128xf32>
    %3 = tpu.matmul %1, %2, %cst {dimension_numbers = #tpu.dot_dimension_numbers<[1], [0], [0], [1], [0, 0, 1, 1], [], []>} : vector<16x32xf32>, vector<32x128xf32>, vector<16x128xf32> -> vector<16x128xf32>
    %c0_5 = arith.constant 0 : index
    %c0_6 = arith.constant 0 : index
    %4 = vector.load %arg3[%c0_5, %c0_6] : memref<1x128xf32, #tpu.memory_space<vmem>>, vector<1x128xf32>
    %5 = vector.broadcast %4 : vector<1x128xf32> to vector<16x128xf32>
    %6 = arith.addf %3, %5 : vector<16x128xf32>
    %cst_7 = arith.constant 0.000000e+00 : f32
    %7 = vector.broadcast %cst_7 : f32 to vector<16x128xf32>
    %8 = arith.maximumf %6, %7 : vector<16x128xf32>
    %c0_8 = arith.constant 0 : index
    %c0_9 = arith.constant 0 : index
    %9 = vector.load %arg4[%c0_8, %c0_9] : memref<128x32xf32, #tpu.memory_space<vmem>>, vector<128x32xf32>
    %cst_10 = arith.constant dense<0.000000e+00> : vector<16x32xf32>
    %10 = tpu.matmul %8, %9, %cst_10 {dimension_numbers = #tpu.dot_dimension_numbers<[1], [0], [0], [1], [0, 0, 1, 1], [], []>} : vector<16x128xf32>, vector<128x32xf32>, vector<16x32xf32> -> vector<16x32xf32>
    %c0_11 = arith.constant 0 : index
    %c0_12 = arith.constant 0 : index
    %11 = vector.load %arg5[%c0_11, %c0_12] : memref<1x32xf32, #tpu.memory_space<vmem>>, vector<1x32xf32>
    %12 = vector.broadcast %11 : vector<1x32xf32> to vector<16x32xf32>
    %13 = arith.addf %10, %12 : vector<16x32xf32>
    %14 = arith.addf %0, %13 : vector<16x32xf32>
    %cst_13 = arith.constant dense<0.000000e+00> : vector<16xf32>
    %15 = vector.multi_reduction <add>, %14, %cst_13 [1] : vector<16x32xf32> to vector<16xf32>
    %16 = vector.shape_cast %15 : vector<16xf32> to vector<16x1xf32>
    %cst_14 = arith.constant 3.200000e+01 : f32
    %17 = vector.broadcast %cst_14 : f32 to vector<16x1xf32>
    %18 = arith.divf %16, %17 : vector<16x1xf32>
    %19 = vector.broadcast %18 : vector<16x1xf32> to vector<16x32xf32>
    %20 = arith.subf %14, %19 : vector<16x32xf32>
    %21 = arith.mulf %20, %20 : vector<16x32xf32>
    %cst_15 = arith.constant dense<0.000000e+00> : vector<16xf32>
    %22 = vector.multi_reduction <add>, %21, %cst_15 [1] : vector<16x32xf32> to vector<16xf32>
    %23 = vector.shape_cast %22 : vector<16xf32> to vector<16x1xf32>
    %cst_16 = arith.constant 3.200000e+01 : f32
    %24 = vector.broadcast %cst_16 : f32 to vector<16x1xf32>
    %25 = arith.divf %23, %24 : vector<16x1xf32>
    %cst_17 = arith.constant 9.99999974E-6 : f32
    %26 = vector.broadcast %cst_17 : f32 to vector<16x1xf32>
    %27 = arith.addf %25, %26 : vector<16x1xf32>
    %28 = math.rsqrt %27 : vector<16x1xf32>
    %29 = vector.broadcast %28 : vector<16x1xf32> to vector<16x32xf32>
    %30 = arith.mulf %20, %29 : vector<16x32xf32>
    %c0_18 = arith.constant 0 : index
    %c0_19 = arith.constant 0 : index
    %31 = vector.load %arg6[%c0_18, %c0_19] : memref<1x32xf32, #tpu.memory_space<vmem>>, vector<1x32xf32>
    %32 = vector.broadcast %31 : vector<1x32xf32> to vector<16x32xf32>
    %33 = arith.mulf %30, %32 : vector<16x32xf32>
    %c0_20 = arith.constant 0 : index
    %c0_21 = arith.constant 0 : index
    %34 = vector.load %arg7[%c0_20, %c0_21] : memref<1x32xf32, #tpu.memory_space<vmem>>, vector<1x32xf32>
    %35 = vector.broadcast %34 : vector<1x32xf32> to vector<16x32xf32>
    %36 = arith.addf %33, %35 : vector<16x32xf32>
    %c0_22 = arith.constant 0 : index
    %c0_23 = arith.constant 0 : index
    %37 = vector.load %arg8[%c0_22, %c0_23] : memref<16x32xf32, #tpu.memory_space<vmem>>, vector<16x32xf32>
    tpu.vector_store %arg8[%c0_22, %c0_23], %36 {strides = array<i32>} : memref<16x32xf32, #tpu.memory_space<vmem>>, vector<16x32xf32>,
    return
  }
  func.func @transform_0(%arg0: i32) -> (i32, i32) {
    %c0_i32 = arith.constant 0 : i32
    %c0_i32_0 = arith.constant 0 : i32
    return %arg0, %c0_i32 : i32, i32
  }
  func.func @transform_1(%arg0: i32) -> (i32, i32) {
    %c0_i32 = arith.constant 0 : i32
    %c0_i32_0 = arith.constant 0 : i32
    %c0_i32_1 = arith.constant 0 : i32
    return %c0_i32, %c0_i32_0 : i32, i32
  }
  func.func @transform_2(%arg0: i32) -> (i32, i32) {
    %c0_i32 = arith.constant 0 : i32
    %c0_i32_0 = arith.constant 0 : i32
    %c0_i32_1 = arith.constant 0 : i32
    return %c0_i32, %c0_i32_0 : i32, i32
  }
  func.func @transform_3(%arg0: i32) -> (i32, i32) {
    %c0_i32 = arith.constant 0 : i32
    %c0_i32_0 = arith.constant 0 : i32
    %c0_i32_1 = arith.constant 0 : i32
    return %c0_i32, %c0_i32_0 : i32, i32
  }
  func.func @transform_4(%arg0: i32) -> (i32, i32) {
    %c0_i32 = arith.constant 0 : i32
    %c0_i32_0 = arith.constant 0 : i32
    %c0_i32_1 = arith.constant 0 : i32
    return %c0_i32, %c0_i32_0 : i32, i32
  }
  func.func @transform_5(%arg0: i32) -> (i32, i32) {
    %c0_i32 = arith.constant 0 : i32
    %c0_i32_0 = arith.constant 0 : i32
    %c0_i32_1 = arith.constant 0 : i32
    return %c0_i32, %c0_i32_0 : i32, i32
  }
  func.func @transform_6(%arg0: i32) -> (i32, i32) {
    %c0_i32 = arith.constant 0 : i32
    %c0_i32_0 = arith.constant 0 : i32
    %c0_i32_1 = arith.constant 0 : i32
    return %c0_i32, %c0_i32_0 : i32, i32
  }
  func.func @transform_7(%arg0: i32) -> (i32, i32) {
    %c0_i32 = arith.constant 0 : i32
    %c0_i32_0 = arith.constant 0 : i32
    return %arg0, %c0_i32 : i32, i32
  }
}

</mosaic_0001>

<bundles_post_ra>
// kernel: tpu_custom_call.1
= control target key start
LH: loop header
LB: loop body
LE: loop exit
PB: predicated region body
PF: predicated region fallthrough
CT: control target
= control target key end

     0   :  { %vm40_vm0 = vcmask 261120   ;;  %s532_s0 = inlined_call_operand.vmem [shape: f32[16,32], index: 0, kind: input, shape index: {}]   ;;  %s533_s1 = inlined_call_operand.vmem [shape: f32[32,128], index: 1, kind: input, shape index: {}]   ;;  %s534_s2 = inlined_call_operand.vmem [shape: f32[1,128], index: 2, kind: input, shape index: {}]   ;;  %s535_s3 = inlined_call_operand.vmem [shape: f32[128,32], index: 3, kind: input, shape index: {}]   ;;  %s536_s4 = inlined_call_operand.vmem [shape: f32[1,32], index: 4, kind: input, shape index: {}]   ;;  %s537_s5 = inlined_call_operand.vmem [shape: f32[1,32], index: 5, kind: input, shape index: {}]   ;;  %s538_s6 = inlined_call_operand.vmem [shape: f32[1,32], index: 6, kind: input, shape index: {}]   ;;  %s539_s7 = inlined_call_operand.hbm [shape: f32[16,32], index: 7, kind: output, shape index: {}]  }
   0x1   :  { %v32_v0 = vld [vmem:[%s533_s1 + $0x18] sm:$0xff]  ;;  %v31_v1 = vld [vmem:[%s533_s1 + $0x10] sm:$0xff]  ;;  %v444_v2 = vld [vmem:[%s532_s0] sm:$0xff] }
   0x2   :  { %317 = vmatprep.subr.mxu0 %v32_v0  ;;  %v30_v3 = vld [vmem:[%s533_s1 + $0x8] sm:$0xff]  ;;  %325 = vmatprep.mubr.msk.f32.mxu0 %vm40_vm0, %v444_v2  ;;  %v139_v4 = vld [vmem:[%s535_s3 + $0x78] sm:$0xff]  ;;  %v138_v5 = vld [vmem:[%s535_s3 + $0x70] sm:$0xff] }
   0x3   :  { %318 = vmatpush3.msra.mxu0 %v32_v0  ;;  %328 = vmatprep.subr.mxu1 %v139_v4  ;;  %v29_v6 = vld [vmem:[%s533_s1] sm:$0xff]  ;;  %v137_v7 = vld [vmem:[%s535_s3 + $0x68] sm:$0xff] }
   0x4   :  { %319 = vmatprep.subr.mxu0 %v31_v1  ;;  %329 = vmatpush3.msra.mxu1 %v139_v4  ;;  %v466_v8 = vld [vmem:[%s532_s0 + $0x8] sm:$0xff]  ;;  %v136_v9 = vld [vmem:[%s535_s3 + $0x60] sm:$0xff] }
   0x5   :  { %320 = vmatpush3.msra.mxu0 %v31_v1  ;;  %330 = vmatprep.subr.mxu1 %v138_v5 }
   0x6   :  { %321 = vmatprep.subr.mxu0 %v30_v3  ;;  %331 = vmatpush3.msra.mxu1 %v138_v5 }
   0x7   :  { %322 = vmatpush3.msra.mxu0 %v30_v3 }
   0x8   :  { %12 = vsyncpa [#allocation3], 0  ;;  %323 = vmatprep.subr.mxu0 %v29_v6  ;;  %332 = vmatprep.subr.mxu1 %v137_v7  ;;  %v135_v10 = vld [vmem:[%s535_s3 + $0x58] sm:$0xff]  ;;  %v134_v11 = vld [vmem:[%s535_s3 + $0x50] sm:$0xff]  ;;  %s392_s23 = smov [#allocation2]  }
   0x9   :  { %324 = vmatpush3.msra.mxu0 %v29_v6  ;;  %333 = vmatpush3.msra.mxu1 %v137_v7  ;;  %v133_v12 = vld [vmem:[%s535_s3 + $0x48] sm:$0xff]  ;;  %v132_v13 = vld [vmem:[%s535_s3 + $0x40] sm:$0xff]  ;;  %v131_v14 = vld [vmem:[%s535_s3 + $0x38] sm:$0xff]  ;;  %s276_s24 = sshll.u32 %s392_s23, 4  ;;  %s277_s24 = int_to_ptr.vmem [resolvable:$true] %s276_s24 }
   0xa   :  { %326 = vmatmul.mubr.msk.f32.vlgmr.msra.gmra.mxu0 %vm40_vm0, %v466_v8  ;;  %334 = vmatprep.subr.mxu1 %v136_v9  ;;  %v130_v15 = vld [vmem:[%s535_s3 + $0x30] sm:$0xff]  ;;  %v129_v16 = vld [vmem:[%s535_s3 + $0x28] sm:$0xff]  ;;  %v128_v17 = vld [vmem:[%s535_s3 + $0x20] sm:$0xff]  ;;  %s370_s25 = scalar_lea.vmem %s277_s24, 256  ;;  %p375_p1 = scmp.lt.s32.totalorder %s277_s24, %s277_s24 }
   0xb   :  { %335 = vmatpush3.msra.mxu1 %v136_v9  ;;  %v127_v18 = vld [vmem:[%s535_s3 + $0x18] sm:$0xff]  ;;  %v126_v19 = vld [vmem:[%s535_s3 + $0x10] sm:$0xff]  ;;  %v125_v20 = vld [vmem:[%s535_s3 + $0x8] sm:$0xff]  ;;  %p371_p0 = scmp.ne.s32.totalorder %s277_s24, %s370_s25  ;;  %p376_p2 = scmp.lt.s32.totalorder %s370_s25, %s370_s25 }
   0xc   :  { %336 = vmatprep.subr.mxu1 %v135_v10  ;;  %v124_v21 = vld [vmem:[%s535_s3] sm:$0xff] }
   0xd   :  { %337 = vmatpush3.msra.mxu1 %v135_v10  ;;  %v287_v22 = vld [vmem:[%s534_s2] ss:$0 sm:$0xff]  ;;  %p377_p3 = por %p376_p2, %p375_p1 }
   0xe   :  { %338 = vmatprep.subr.mxu1 %v134_v11  ;;  %v290_v30 = vld [vmem:[%s536_s4] ss:$0 sm:$0xff] }
   0xf   :  { %339 = vmatpush3.msra.mxu1 %v134_v11  ;;  %v291_v55 = vld [vmem:[%s537_s5] ss:$0 sm:$0xff]  ;;  %p378_p4 = pnand %p377_p3, %p371_p0 }
  0x10   :  { %340 = vmatprep.subr.mxu1 %v133_v12  ;;  %v292_v57 = vld [vmem:[%s538_s6] ss:$0 sm:$0xff] }
  0x11   :  { %341 = vmatpush3.msra.mxu1 %v133_v12 }
  0x12   :  { %342 = vmatprep.subr.mxu1 %v132_v13 }
  0x13   :  { %343 = vmatpush3.msra.mxu1 %v132_v13 }
  0x14   :  { %344 = vmatprep.subr.mxu1 %v131_v14 }
  0x15   :  { %345 = vmatpush3.msra.mxu1 %v131_v14 }
  0x16   :  { %346 = vmatprep.subr.mxu1 %v130_v15 }
  0x17   :  { %347 = vmatpush3.msra.mxu1 %v130_v15 }
  0x18   :  { %348 = vmatprep.subr.mxu1 %v129_v16 }
  0x19   :  { %349 = vmatpush3.msra.mxu1 %v129_v16 }
  0x1a   :  { %350 = vmatprep.subr.mxu1 %v128_v17 }
  0x1b   :  { %351 = vmatpush3.msra.mxu1 %v128_v17 }
  0x1c   :  { %352 = vmatprep.subr.mxu1 %v127_v18 }
  0x1d   :  { %353 = vmatpush3.msra.mxu1 %v127_v18 }
  0x1e   :  { %354 = vmatprep.subr.mxu1 %v126_v19 }
  0x1f   :  { %355 = vmatpush3.msra.mxu1 %v126_v19 }
  0x20   :  { %356 = vmatprep.subr.mxu1 %v125_v20 }
  0x21   :  { %357 = vmatpush3.msra.mxu1 %v125_v20 }
  0x22   :  { %358 = vmatprep.subr.mxu1 %v124_v21 }
  0x23   :  { %359 = vmatpush3.msra.mxu1 %v124_v21 }
  0xca   :  { %v327_v23 = vpop.f32.mrf.mxu0 }
  0xcb   :  { %v119_v24 = vadd.f32 %v327_v23, %v287_v22 }
  0xcc   :  { %v113_v25 = vpop.f32.mrf.mxu0 }
  0xcd   :  { %v114_v26 = vadd.f32 %v287_v22, %v113_v25  ;;  %v123_v28 = vmax.f32 %v119_v24, 0.0 }
  0xcf   :  { %v122_v27 = vmax.f32 %v114_v26, 0.0 }
  0xd1   :  { %360 = vmatprep.mubr.f32.mxu1 %v122_v27 }
  0xd2   :  { %361 = vmatmul.mubr.f32.vlgmr.msra.gmra.mxu1 %v123_v28 }
 0x192   :  { %v362_v29 = vpop.f32.mrf.mxu1 }
 0x193   :  { %v219_v32 = vadd.f32 %v362_v29, %v290_v30 }
 0x194   :  { %v213_v31 = vpop.f32.mrf.mxu1 }
 0x195   :  { %v214_v33 = vadd.f32 %v290_v30, %v213_v31  ;;  %v223_v36 = vadd.f32 %v219_v32, %v466_v8 }
 0x197   :  { %v222_v34 = vadd.f32 %v214_v33, %v444_v2  ;;  %v227_v37 = vsel %vm40_vm0, %v223_v36, 0.0 }
 0x199   :  { %v224_v35 = vsel %vm40_vm0, %v222_v34, 0.0 }
 0x19a   :  { %225 = vadd.xlane.f32.xlu0 %v224_v35 }
 0x19e   :  { %228 = vadd.xlane.f32.xlu0 %v227_v37 }
 0x223   :  { %v226_v38 = vpop.xlane.xlu0 %225 }
 0x224   :  { %v231_v39 = vmul.f32 0.03125, %v226_v38 }
 0x226   :  { %v233_v40 = vsub.f32 %v222_v34, %v231_v39 }
 0x227   :  { %v229_v41 = vpop.xlane.xlu0 %228 }
 0x228   :  { %v232_v42 = vmul.f32 0.03125, %v229_v41  ;;  %v235_v43 = vmul.f32 %v233_v40, %v233_v40 }
 0x22a   :  { %v234_v44 = vsub.f32 %v223_v36, %v232_v42  ;;  %v237_v45 = vsel %vm40_vm0, %v235_v43, 0.0 }
 0x22b   :  { %238 = vadd.xlane.f32.xlu1 %v237_v45 }
 0x22c   :  { %v236_v46 = vmul.f32 %v234_v44, %v234_v44 }
 0x22e   :  { %v240_v47 = vsel %vm40_vm0, %v236_v46, 0.0 }
 0x22f   :  { %241 = vadd.xlane.f32.xlu1 %v240_v47 }
 0x2b4   :  { %v239_v48 = vpop.xlane.xlu1 %238 }
 0x2b5   :  { %v243_v49 = vmul.f32 0.03125, %v239_v48 }
 0x2b7   :  { %v245_v50 = vadd.f32 1e-05, %v243_v49 }
 0x2b8   :  { %v242_v51 = vpop.xlane.xlu1 %241 }
 0x2b9   :  { %366 = vrsqrt.f32 %v245_v50  ;;  %v244_v52 = vmul.f32 0.03125, %v242_v51 }
 0x2bb   :  { %v246_v53 = vadd.f32 1e-05, %v244_v52 }
 0x2bd   :  { %368 = vrsqrt.f32 %v246_v53 }
 0x2c6   :  { %v367_v54 = vpop.eup %366 }
 0x2c7   :  { %v249_v56 = vmul.f32 %v367_v54, %v233_v40 }
 0x2c9   :  { %v258_v58 = vmul.f32 %v291_v55, %v249_v56 }
 0x2ca   :  { %v369_v59 = vpop.eup %368 }
 0x2cb   :  { %v250_v60 = vmul.f32 %v369_v59, %v234_v44  ;;  %v267_v61 = vadd.f32 %v292_v57, %v258_v58 }
 0x2cd   :  { %v259_v62 = vmul.f32 %v291_v55, %v250_v60  ;;  %269 = vst.msk [vmem:[#allocation2] sm:$0xff] %vm40_vm0, %v267_v61 }
 0x2cf   :  { %v268_v63 = vadd.f32 %v292_v57, %v259_v62 }
 0x2d1   :  { %270 = vst.msk [vmem:[#allocation2 + $0x8] sm:$0xff] %vm40_vm0, %v268_v63 }
 0x2d2   :  { %381 = shalt.err (!%p378_p4)
}
 0x2d3   :  { %s393_s5 = smov 128   ;;  %s394_s6 = smov 8  }
 0x2d4   :  { %282 = dma.vmem_to_hbm [thread:$0]  %s277_s24, 256, %s539_s7, [#allocation3], %s393_s5, %s393_s5, %s394_s6  }
 0x2d5   :  { %390 = dma.done.wait [#allocation3], 256  }
 0x2d6   :  { %391 = vsyncadd [#allocation3], 4294967040 }
 0x2d7   :  { %286 = vsyncpa [#allocation3], 1 }

// kernel: tpu_custom_call.1
= control target key start
LH: loop header
LB: loop body
LE: loop exit
PB: predicated region body
PF: predicated region fallthrough
CT: control target
= control target key end

     0   :  { %vm40_vm0 = vcmask 261120   ;;  %s532_s0 = inlined_call_operand.vmem [shape: f32[16,32], index: 0, kind: input, shape index: {}]   ;;  %s533_s1 = inlined_call_operand.vmem [shape: f32[32,128], index: 1, kind: input, shape index: {}]   ;;  %s534_s2 = inlined_call_operand.vmem [shape: f32[1,128], index: 2, kind: input, shape index: {}]   ;;  %s535_s3 = inlined_call_operand.vmem [shape: f32[128,32], index: 3, kind: input, shape index: {}]   ;;  %s536_s4 = inlined_call_operand.vmem [shape: f32[1,32], index: 4, kind: input, shape index: {}]   ;;  %s537_s5 = inlined_call_operand.vmem [shape: f32[1,32], index: 5, kind: input, shape index: {}]   ;;  %s538_s6 = inlined_call_operand.vmem [shape: f32[1,32], index: 6, kind: input, shape index: {}]   ;;  %s539_s7 = inlined_call_operand.hbm [shape: f32[16,32], index: 7, kind: output, shape index: {}]  }
   0x1   :  { %v32_v0 = vld [vmem:[%s533_s1 + $0x18] sm:$0xff]  ;;  %v31_v1 = vld [vmem:[%s533_s1 + $0x10] sm:$0xff]  ;;  %v444_v2 = vld [vmem:[%s532_s0] sm:$0xff] }
   0x2   :  { %317 = vmatprep.subr.mxu0 %v32_v0  ;;  %v30_v3 = vld [vmem:[%s533_s1 + $0x8] sm:$0xff]  ;;  %325 = vmatprep.mubr.msk.f32.mxu0 %vm40_vm0, %v444_v2  ;;  %v139_v4 = vld [vmem:[%s535_s3 + $0x78] sm:$0xff]  ;;  %v138_v5 = vld [vmem:[%s535_s3 + $0x70] sm:$0xff] }
   0x3   :  { %318 = vmatpush3.msra.mxu0 %v32_v0  ;;  %328 = vmatprep.subr.mxu1 %v139_v4  ;;  %v29_v6 = vld [vmem:[%s533_s1] sm:$0xff]  ;;  %v137_v7 = vld [vmem:[%s535_s3 + $0x68] sm:$0xff] }
   0x4   :  { %319 = vmatprep.subr.mxu0 %v31_v1  ;;  %329 = vmatpush3.msra.mxu1 %v139_v4  ;;  %v466_v8 = vld [vmem:[%s532_s0 + $0x8] sm:$0xff]  ;;  %v136_v9 = vld [vmem:[%s535_s3 + $0x60] sm:$0xff] }
   0x5   :  { %320 = vmatpush3.msra.mxu0 %v31_v1  ;;  %330 = vmatprep.subr.mxu1 %v138_v5 }
   0x6   :  { %321 = vmatprep.subr.mxu0 %v30_v3  ;;  %331 = vmatpush3.msra.mxu1 %v138_v5 }
   0x7   :  { %322 = vmatpush3.msra.mxu0 %v30_v3 }
   0x8   :  { %12 = vsyncpa [#allocation3], 0  ;;  %323 = vmatprep.subr.mxu0 %v29_v6  ;;  %332 = vmatprep.subr.mxu1 %v137_v7  ;;  %v135_v10 = vld [vmem:[%s535_s3 + $0x58] sm:$0xff]  ;;  %v134_v11 = vld [vmem:[%s535_s3 + $0x50] sm:$0xff]  ;;  %s392_s23 = smov [#allocation2]  }
   0x9   :  { %324 = vmatpush3.msra.mxu0 %v29_v6  ;;  %333 = vmatpush3.msra.mxu1 %v137_v7  ;;  %v133_v12 = vld [vmem:[%s535_s3 + $0x48] sm:$0xff]  ;;  %v132_v13 = vld [vmem:[%s535_s3 + $0x40] sm:$0xff]  ;;  %v131_v14 = vld [vmem:[%s535_s3 + $0x38] sm:$0xff]  ;;  %s276_s24 = sshll.u32 %s392_s23, 4  ;;  %s277_s24 = int_to_ptr.vmem [resolvable:$true] %s276_s24 }
   0xa   :  { %326 = vmatmul.mubr.msk.f32.vlgmr.msra.gmra.mxu0 %vm40_vm0, %v466_v8  ;;  %334 = vmatprep.subr.mxu1 %v136_v9  ;;  %v130_v15 = vld [vmem:[%s535_s3 + $0x30] sm:$0xff]  ;;  %v129_v16 = vld [vmem:[%s535_s3 + $0x28] sm:$0xff]  ;;  %v128_v17 = vld [vmem:[%s535_s3 + $0x20] sm:$0xff]  ;;  %s370_s25 = scalar_lea.vmem %s277_s24, 256  ;;  %p375_p1 = scmp.lt.s32.totalorder %s277_s24, %s277_s24 }
   0xb   :  { %335 = vmatpush3.msra.mxu1 %v136_v9  ;;  %v127_v18 = vld [vmem:[%s535_s3 + $0x18] sm:$0xff]  ;;  %v126_v19 = vld [vmem:[%s535_s3 + $0x10] sm:$0xff]  ;;  %v125_v20 = vld [vmem:[%s535_s3 + $0x8] sm:$0xff]  ;;  %p371_p0 = scmp.ne.s32.totalorder %s277_s24, %s370_s25  ;;  %p376_p2 = scmp.lt.s32.totalorder %s370_s25, %s370_s25 }
   0xc   :  { %336 = vmatprep.subr.mxu1 %v135_v10  ;;  %v124_v21 = vld [vmem:[%s535_s3] sm:$0xff] }
   0xd   :  { %337 = vmatpush3.msra.mxu1 %v135_v10  ;;  %v287_v22 = vld [vmem:[%s534_s2] ss:$0 sm:$0xff]  ;;  %p377_p3 = por %p376_p2, %p375_p1 }
   0xe   :  { %338 = vmatprep.subr.mxu1 %v134_v11  ;;  %v290_v30 = vld [vmem:[%s536_s4] ss:$0 sm:$0xff] }
   0xf   :  { %339 = vmatpush3.msra.mxu1 %v134_v11  ;;  %v291_v55 = vld [vmem:[%s537_s5] ss:$0 sm:$0xff]  ;;  %p378_p4 = pnand %p377_p3, %p371_p0 }
  0x10   :  { %340 = vmatprep.subr.mxu1 %v133_v12  ;;  %v292_v57 = vld [vmem:[%s538_s6] ss:$0 sm:$0xff] }
  0x11   :  { %341 = vmatpush3.msra.mxu1 %v133_v12 }
  0x12   :  { %342 = vmatprep.subr.mxu1 %v132_v13 }
  0x13   :  { %343 = vmatpush3.msra.mxu1 %v132_v13 }
  0x14   :  { %344 = vmatprep.subr.mxu1 %v131_v14 }
  0x15   :  { %345 = vmatpush3.msra.mxu1 %v131_v14 }
  0x16   :  { %346 = vmatprep.subr.mxu1 %v130_v15 }
  0x17   :  { %347 = vmatpush3.msra.mxu1 %v130_v15 }
  0x18   :  { %348 = vmatprep.subr.mxu1 %v129_v16 }
  0x19   :  { %349 = vmatpush3.msra.mxu1 %v129_v16 }
  0x1a   :  { %350 = vmatprep.subr.mxu1 %v128_v17 }
  0x1b   :  { %351 = vmatpush3.msra.mxu1 %v128_v17 }
  0x1c   :  { %352 = vmatprep.subr.mxu1 %v127_v18 }
  0x1d   :  { %353 = vmatpush3.msra.mxu1 %v127_v18 }
  0x1e   :  { %354 = vmatprep.subr.mxu1 %v126_v19 }
  0x1f   :  { %355 = vmatpush3.msra.mxu1 %v126_v19 }
  0x20   :  { %356 = vmatprep.subr.mxu1 %v125_v20 }
  0x21   :  { %357 = vmatpush3.msra.mxu1 %v125_v20 }
  0x22   :  { %358 = vmatprep.subr.mxu1 %v124_v21 }
  0x23   :  { %359 = vmatpush3.msra.mxu1 %v124_v21 }
  0xca   :  { %v327_v23 = vpop.f32.mrf.mxu0 }
  0xcb   :  { %v119_v24 = vadd.f32 %v327_v23, %v287_v22 }
  0xcc   :  { %v113_v25 = vpop.f32.mrf.mxu0 }
  0xcd   :  { %v114_v26 = vadd.f32 %v287_v22, %v113_v25  ;;  %v123_v28 = vmax.f32 %v119_v24, 0.0 }
  0xcf   :  { %v122_v27 = vmax.f32 %v114_v26, 0.0 }
  0xd1   :  { %360 = vmatprep.mubr.f32.mxu1 %v122_v27 }
  0xd2   :  { %361 = vmatmul.mubr.f32.vlgmr.msra.gmra.mxu1 %v123_v28 }
 0x192   :  { %v362_v29 = vpop.f32.mrf.mxu1 }
 0x193   :  { %v219_v32 = vadd.f32 %v362_v29, %v290_v30 }
 0x194   :  { %v213_v31 = vpop.f32.mrf.mxu1 }
 0x195   :  { %v214_v33 = vadd.f32 %v290_v30, %v213_v31  ;;  %v223_v36 = vadd.f32 %v219_v32, %v466_v8 }
 0x197   :  { %v222_v34 = vadd.f32 %v214_v33, %v444_v2  ;;  %v227_v37 = vsel %vm40_vm0, %v223_v36, 0.0 }
 0x199   :  { %v224_v35 = vsel %vm40_vm0, %v222_v34, 0.0 }
 0x19a   :  { %225 = vadd.xlane.f32.xlu0 %v224_v35 }
 0x19e   :  { %228 = vadd.xlane.f32.xlu0 %v227_v37 }
 0x223   :  { %v226_v38 = vpop.xlane.xlu0 %225 }
 0x224   :  { %v231_v39 = vmul.f32 0.03125, %v226_v38 }
 0x226   :  { %v233_v40 = vsub.f32 %v222_v34, %v231_v39 }
 0x227   :  { %v229_v41 = vpop.xlane.xlu0 %228 }
 0x228   :  { %v232_v42 = vmul.f32 0.03125, %v229_v41  ;;  %v235_v43 = vmul.f32 %v233_v40, %v233_v40 }
 0x22a   :  { %v234_v44 = vsub.f32 %v223_v36, %v232_v42  ;;  %v237_v45 = vsel %vm40_vm0, %v235_v43, 0.0 }
 0x22b   :  { %238 = vadd.xlane.f32.xlu1 %v237_v45 }
 0x22c   :  { %v236_v46 = vmul.f32 %v234_v44, %v234_v44 }
 0x22e   :  { %v240_v47 = vsel %vm40_vm0, %v236_v46, 0.0 }
 0x22f   :  { %241 = vadd.xlane.f32.xlu1 %v240_v47 }
 0x2b4   :  { %v239_v48 = vpop.xlane.xlu1 %238 }
 0x2b5   :  { %v243_v49 = vmul.f32 0.03125, %v239_v48 }
 0x2b7   :  { %v245_v50 = vadd.f32 1e-05, %v243_v49 }
 0x2b8   :  { %v242_v51 = vpop.xlane.xlu1 %241 }
 0x2b9   :  { %366 = vrsqrt.f32 %v245_v50  ;;  %v244_v52 = vmul.f32 0.03125, %v242_v51 }
 0x2bb   :  { %v246_v53 = vadd.f32 1e-05, %v244_v52 }
 0x2bd   :  { %368 = vrsqrt.f32 %v246_v53 }
 0x2c6   :  { %v367_v54 = vpop.eup %366 }
 0x2c7   :  { %v249_v56 = vmul.f32 %v367_v54, %v233_v40 }
 0x2c9   :  { %v258_v58 = vmul.f32 %v291_v55, %v249_v56 }
 0x2ca   :  { %v369_v59 = vpop.eup %368 }
 0x2cb   :  { %v250_v60 = vmul.f32 %v369_v59, %v234_v44  ;;  %v267_v61 = vadd.f32 %v292_v57, %v258_v58 }
 0x2cd   :  { %v259_v62 = vmul.f32 %v291_v55, %v250_v60  ;;  %269 = vst.msk [vmem:[#allocation2] sm:$0xff] %vm40_vm0, %v267_v61 }
 0x2cf   :  { %v268_v63 = vadd.f32 %v292_v57, %v259_v62 }
 0x2d1   :  { %270 = vst.msk [vmem:[#allocation2 + $0x8] sm:$0xff] %vm40_vm0, %v268_v63 }
 0x2d2   :  { %381 = shalt.err (!%p378_p4)
}
 0x2d3   :  { %s393_s5 = smov 128   ;;  %s394_s6 = smov 8  }
 0x2d4   :  { %282 = dma.vmem_to_hbm [thread:$0]  %s277_s24, 256, %s539_s7, [#allocation3], %s393_s5, %s393_s5, %s394_s6  }
 0x2d5   :  { %390 = dma.done.wait [#allocation3], 256  }
 0x2d6   :  { %391 = vsyncadd [#allocation3], 4294967040 }
 0x2d7   :  { %286 = vsyncpa [#allocation3], 1 }

</bundles_post_ra>
